<compile_context>
chip_gen: v6e
topology: v6e:2x2x1
jax: 0.10.0
libtpu: 0.0.40
codegen_flags: <defaults>
</compile_context>

<pallas_src>
import jax
import jax.numpy as jnp
from jax.experimental import pallas as pl
from jax.experimental.pallas import tpu as pltpu

_LANE = 128
_SUBLANE = 8
_MIN_BLOCK_B = _LANE * _SUBLANE  # 1024 rows: smallest lane-dense (8, 128) tile


def hybrid_kernel(theta_ref, lam_ref, o_ref):
    """Closed-form single-qubit expectation on a lane-dense (rows, 128) tile.

    P(1) = 0.5 * (1 + sin(theta) * cos(lambda)); phi cancels analytically.
    Full-width vregs -> unmasked stores, 128 useful lanes per EUP push.
    """
    o_ref[...] = 0.5 * (1.0 + jnp.sin(theta_ref[...]) * jnp.cos(lam_ref[...]))


def _hybrid_closed_form(theta, lam):
    return 0.5 * (1.0 + jnp.sin(theta) * jnp.cos(lam))


def hybrid_forward(x, *, block_b=8192, min_pallas_b=4096, force_pallas=False):
    """Forward pass of the Hybrid layer.

    x: (B, 3) float32 rows of [theta, phi, lambda] angles.
    Returns: (B, 1) float32 expectation of the measured bit, P(|1>).
    """
    x = jnp.asarray(x, jnp.float32)
    B = x.shape[0]
    theta = x[:, 0]
    lam = x[:, 2]  # phi (column 1) cancels analytically; never sent to the kernel

    # Tiny batches (including the module-faithful B=1 call): a fused XLA
    # elementwise op beats any pallas_call launch/grid-step overhead.
    if not force_pallas and B < min_pallas_b:
        return _hybrid_closed_form(theta, lam)[:, None]

    # --- Lane-dense Pallas path ---
    # Block size: multiple of 1024 rows (=> (8k, 128) tiles), clipped so a
    # small forced batch still uses a single minimal block.
    block_b = max(_MIN_BLOCK_B, (block_b // _MIN_BLOCK_B) * _MIN_BLOCK_B)
    block_b = min(block_b, pl.cdiv(B, _MIN_BLOCK_B) * _MIN_BLOCK_B)
    n_blocks = pl.cdiv(B, block_b)
    Bp = n_blocks * block_b
    if Bp != B:
        # Pad only the two 1-D columns we actually use (cheap vs. a full
        # (B, 3) pad); padded rows produce 0.5 and are sliced off below.
        theta = jnp.pad(theta, (0, Bp - B))
        lam = jnp.pad(lam, (0, Bp - B))

    rows = Bp // _LANE
    block_rows = block_b // _LANE  # multiple of 8 by construction
    theta2 = theta.reshape(rows, _LANE)
    lam2 = lam.reshape(rows, _LANE)

    out = pl.pallas_call(
        hybrid_kernel,
        out_shape=jax.ShapeDtypeStruct((rows, _LANE), jnp.float32),
        grid=(n_blocks,),
        in_specs=[
            pl.BlockSpec((block_rows, _LANE), lambda i: (i, 0)),
            pl.BlockSpec((block_rows, _LANE), lambda i: (i, 0)),
        ],
        out_specs=pl.BlockSpec((block_rows, _LANE), lambda i: (i, 0)),
        compiler_params=pltpu.CompilerParams(
            dimension_semantics=("parallel",)
        ),
    )(theta2, lam2)
    return out.reshape(-1)[:B, None]


if __name__ == "__main__":
    key = jax.random.PRNGKey(0)

    # --- Module-faithful call: single circuit, 3 angles -> (1, 1) ---
    # Auto-dispatch uses the fused-XLA fast path (Pallas overhead would
    # dominate at B=1).
    x1 = jax.random.uniform(
        key, (1, 3), dtype=jnp.float32, minval=-jnp.pi, maxval=jnp.pi
    )
    out1 = jax.block_until_ready(hybrid_forward(x1))
    ref1 = 0.5 * (1.0 + jnp.sin(x1[:, 0:1]) * jnp.cos(x1[:, 2:3]))
    assert out1.shape == (1, 1)
    assert float(jnp.max(jnp.abs(out1 - ref1))) < 1e-5

    # --- Small batch forced through the Pallas kernel (exercises the
    #     lane-dense tile + ragged-tail padding path) ---
    xb = jax.random.uniform(
        jax.random.PRNGKey(1), (16, 3), dtype=jnp.float32,
        minval=-jnp.pi, maxval=jnp.pi,
    )
    outb = jax.block_until_ready(hybrid_forward(xb, force_pallas=True))
    refb = 0.5 * (1.0 + jnp.sin(xb[:, 0:1]) * jnp.cos(xb[:, 2:3]))
    assert outb.shape == (16, 1)
    assert float(jnp.max(jnp.abs(outb - refb))) < 1e-5

    # --- Larger (still small) batch: 2048 rows -> one (16, 128) tile ---
    xc = jax.random.uniform(
        jax.random.PRNGKey(2), (2048, 3), dtype=jnp.float32,
        minval=-jnp.pi, maxval=jnp.pi,
    )
    outc = jax.block_until_ready(hybrid_forward(xc, force_pallas=True))
    refc = 0.5 * (1.0 + jnp.sin(xc[:, 0:1]) * jnp.cos(xc[:, 2:3]))
    assert outc.shape == (2048, 1)
    assert float(jnp.max(jnp.abs(outc - refc))) < 1e-5

    print("KERNEL_OK")
</pallas_src>

<mosaic_0001>
module attributes {stable_mosaic.version = 11 : i64} {
  func.func @hybrid_kernel(%arg0: i32, %arg1: memref<8x128xf32, #tpu.memory_space<vmem>>, %arg2: memref<8x128xf32, #tpu.memory_space<vmem>>, %arg3: memref<8x128xf32, #tpu.memory_space<vmem>>) attributes {dimension_semantics = [#tpu.dimension_semantics<parallel>], iteration_bounds = array<i64: 1>, scalar_prefetch = 0 : i64, scratch_operands = 0 : i64, tpu.core_type = #tpu.core_type<tc>, window_params = [{transform_indices = @transform_0, window_bounds = array<i64: 8, 128>}, {transform_indices = @transform_1, window_bounds = array<i64: 8, 128>}, {transform_indices = @transform_2, window_bounds = array<i64: 8, 128>}]} {
    %c0 = arith.constant 0 : index
    %c0_0 = arith.constant 0 : index
    %0 = vector.load %arg1[%c0, %c0_0] : memref<8x128xf32, #tpu.memory_space<vmem>>, vector<8x128xf32>
    %1 = math.sin %0 : vector<8x128xf32>
    %c0_1 = arith.constant 0 : index
    %c0_2 = arith.constant 0 : index
    %2 = vector.load %arg2[%c0_1, %c0_2] : memref<8x128xf32, #tpu.memory_space<vmem>>, vector<8x128xf32>
    %3 = math.cos %2 : vector<8x128xf32>
    %4 = arith.mulf %1, %3 : vector<8x128xf32>
    %cst = arith.constant 1.000000e+00 : f32
    %5 = vector.broadcast %cst : f32 to vector<8x128xf32>
    %6 = arith.addf %5, %4 : vector<8x128xf32>
    %cst_3 = arith.constant 5.000000e-01 : f32
    %7 = vector.broadcast %cst_3 : f32 to vector<8x128xf32>
    %8 = arith.mulf %7, %6 : vector<8x128xf32>
    %c0_4 = arith.constant 0 : index
    %c0_5 = arith.constant 0 : index
    %9 = vector.load %arg3[%c0_4, %c0_5] : memref<8x128xf32, #tpu.memory_space<vmem>>, vector<8x128xf32>
    tpu.vector_store %arg3[%c0_4, %c0_5], %8 {strides = array<i32>} : memref<8x128xf32, #tpu.memory_space<vmem>>, vector<8x128xf32>,
    return
  }
  func.func @transform_0(%arg0: i32) -> (i32, i32) {
    %c0_i32 = arith.constant 0 : i32
    %c0_i32_0 = arith.constant 0 : i32
    return %arg0, %c0_i32 : i32, i32
  }
  func.func @transform_1(%arg0: i32) -> (i32, i32) {
    %c0_i32 = arith.constant 0 : i32
    %c0_i32_0 = arith.constant 0 : i32
    return %arg0, %c0_i32 : i32, i32
  }
  func.func @transform_2(%arg0: i32) -> (i32, i32) {
    %c0_i32 = arith.constant 0 : i32
    %c0_i32_0 = arith.constant 0 : i32
    return %arg0, %c0_i32 : i32, i32
  }
}

</mosaic_0001>

<bundles_post_ra>
// kernel: tpu_custom_call.1
= control target key start
LH: loop header
LB: loop body
LE: loop exit
PB: predicated region body
PF: predicated region fallthrough
CT: control target
= control target key end

     0   :  { %7 = vsyncpa [#allocation3], 0  ;;  %s483_s0 = inlined_call_operand.hbm [shape: f32[8,128], index: 0, kind: input, shape index: {}]   ;;  %s484_s1 = inlined_call_operand.hbm [shape: f32[8,128], index: 1, kind: input, shape index: {}]   ;;  %s485_s2 = inlined_call_operand.hbm [shape: f32[8,128], index: 2, kind: output, shape index: {}]  }
   0x1   :  { %8 = vsyncpa [#allocation6], 0 }
   0x2   :  { %9 = vsyncpa [#allocation4], 0  ;;  %s364_s9 = smov [#allocation2]   ;;  %s365_s11 = smov [#allocation5]  }
   0x3   :  { %s16_s10 = sshll.u32 %s364_s9, 4  ;;  %s26_s12 = sshll.u32 %s365_s11, 4  ;;  %s17_s10 = int_to_ptr.vmem [resolvable:$true] %s16_s10  ;;  %s27_s12 = int_to_ptr.vmem [resolvable:$true] %s26_s12 }
   0x4   :  { %s306_s13 = scalar_lea.vmem %s17_s10, 128  ;;  %p311_p1 = scmp.lt.s32.totalorder %s17_s10, %s17_s10 }
   0x5   :  { %p307_p0 = scmp.ne.s32.totalorder %s17_s10, %s306_s13  ;;  %p312_p2 = scmp.lt.s32.totalorder %s306_s13, %s306_s13 }
   0x7   :  { %p313_p3 = por %p312_p2, %p311_p1 }
   0x9   :  { %p314_p4 = pnand %p313_p3, %p307_p0 }
   0xb   :  { %317 = shalt.err (!%p314_p4)
}
   0xc   :  { %19 = dma.hbm_to_vmem [thread:$0]  %s483_s0, 128, %s17_s10, [#allocation3]  }
   0xd   :  { %s326_s16 = scalar_lea.vmem %s27_s12, 128  ;;  %p331_p6 = scmp.lt.s32.totalorder %s27_s12, %s27_s12 }
   0xe   :  { %p327_p5 = scmp.ne.s32.totalorder %s27_s12, %s326_s16  ;;  %p332_p7 = scmp.lt.s32.totalorder %s326_s16, %s326_s16 }
  0x10   :  { %p333_p8 = por %p332_p7, %p331_p6 }
  0x12   :  { %p334_p9 = pnand %p333_p8, %p327_p5 }
  0x14   :  { %337 = shalt.err (!%p334_p9)
}
  0x15   :  { %29 = dma.hbm_to_vmem [thread:$0]  %s484_s1, 128, %s27_s12, [#allocation6]  }
  0x16   :  { %358 = dma.done.wait [#allocation3], 128  }
  0x17   :  { %359 = vsyncadd [#allocation3], 4294967168 }
  0x18   :  { %360 = dma.done.wait [#allocation6], 128  }
  0x19   :  { %361 = vsyncadd [#allocation6], 4294967168  ;;  %v394_v0 = vld [vmem:[#allocation2] sm:$0xff]  ;;  %v396_v1 = vld [vmem:[#allocation5] sm:$0xff]  ;;  %v366_v24 = vmov 683565275  }
  0x1a   :  { %v37_v2 = vand.u32 2147483647, %v394_v0  ;;  %v40_v3 = vand.u32 2139095040, %v394_v0  ;;  %v142_v4 = vand.u32 2147483647, %v396_v1  ;;  %v145_v5 = vand.u32 2139095040, %v396_v1 }
  0x1b   :  { %v367_v26 = vmov 2475754826   ;;  %v368_v28 = vmov 2131351028   ;;  %v369_v30 = vmov 2102212464  }
  0x1c   :  { %v41_v6 = vshrl.u32 %v40_v3, 23  ;;  %v44_v7 = vand.u32 8388607, %v37_v2  ;;  %v146_v8 = vshrl.u32 %v145_v5, 23  ;;  %v149_v9 = vand.u32 8388607, %v142_v4 }
  0x1d   :  { %v370_v32 = vmov 920167782   ;;  %v371_v40 = vmov 1326507024   ;;  %vm39_vm14 = vcmp.lt.s32.totalorder %v394_v0, 0  ;;  %s372_s0 = smov [#allocation7]  }
  0x1e   :  { %v265_v10 = vadd.s32 4294967169, %v41_v6  ;;  %v269_v11 = vadd.s32 4294967169, %v146_v8  ;;  %v45_v13 = vor.u32 8388608, %v44_v7  ;;  %v150_v14 = vor.u32 8388608, %v149_v9  ;;  %s255_s1 = sshll.u32 %s372_s0, 4  ;;  %s256_s1 = int_to_ptr.vmem [resolvable:$true] %s255_s1 }
  0x1f   :  { %vm457_vm15 = vcmp.le.f32.partialorder %v37_v2, 0.7853982  ;;  %s338_s19 = scalar_lea.vmem %s256_s1, 128  ;;  %p343_p11 = scmp.lt.s32.totalorder %s256_s1, %s256_s1 }
  0x20   :  { %v47_v12 = vadd.s32 1, %v265_v10  ;;  %v152_v15 = vadd.s32 1, %v269_v11  ;;  %v406_v20 = vshll.u32 %v45_v13, 8  ;;  %v408_v22 = vshll.u32 %v150_v14, 8  ;;  %p339_p10 = scmp.ne.s32.totalorder %s256_s1, %s338_s19  ;;  %p344_p12 = scmp.lt.s32.totalorder %s338_s19, %s338_s19 }
  0x22   :  { %vm48_vm0 = vcmp.gt.s32.totalorder %v47_v12, 0  ;;  %vm153_vm1 = vcmp.gt.s32.totalorder %v152_v15, 0  ;;  %p345_p13 = por %p344_p12, %p343_p11 }
  0x23   :  { %v49_v16 = vsel %vm48_vm0, %v47_v12, 0  ;;  %v154_v19 = vsel %vm153_vm1, %v152_v15, 0  ;;  %vm144_vm0 = vcmp.lt.s32.totalorder %v396_v1, 0  ;;  %vm467_vm1 = vcmp.le.f32.partialorder %v142_v4, 0.7853982 }
  0x24   :  { %v50_v17 = vshrl.u32 %v49_v16, 5  ;;  %v51_v18 = vand.u32 31, %v49_v16  ;;  %v156_v21 = vand.u32 31, %v154_v19  ;;  %v410_v34 = vshrl.u32 %v154_v19, 5  ;;  %p346_p0 = pnand %p345_p13, %p339_p10 }
  0x26   :  { %v52_v23 = vsub.s32 32, %v51_v18  ;;  %v54_v25 = vshll.u32 %v366_v24, %v51_v18  ;;  %v57_v27 = vshll.u32 %v367_v26, %v51_v18  ;;  %v60_v29 = vshll.u32 %v368_v28, %v51_v18 }
  0x27   :  { %v63_v31 = vshll.u32 %v369_v30, %v51_v18  ;;  %v66_v33 = vshll.u32 %v370_v32, %v51_v18  ;;  %vm69_vm2 = vcmp.lt.s32.totalorder %v50_v17, 1  ;;  %vm70_vm3 = vcmp.lt.s32.totalorder %v50_v17, 2 }
  0x28   :  { %v53_v35 = vshrl.u32 %v366_v24, %v52_v23  ;;  %v55_v36 = vshrl.u32 %v367_v26, %v52_v23  ;;  %v58_v37 = vshrl.u32 %v368_v28, %v52_v23  ;;  %v61_v38 = vshrl.u32 %v369_v30, %v52_v23 }
  0x29   :  { %v64_v39 = vshrl.u32 %v370_v32, %v52_v23  ;;  %v67_v41 = vshrl.u32 %v371_v40, %v52_v23  ;;  %vm72_vm4 = vcmp.lt.s32.totalorder %v50_v17, 4  ;;  %v157_v45 = vsub.s32 32, %v156_v21 }
  0x2a   :  { %v56_v42 = vor.u32 %v55_v36, %v54_v25  ;;  %v59_v43 = vor.u32 %v58_v37, %v57_v27  ;;  %v62_v44 = vor.u32 %v61_v38, %v60_v29  ;;  %vm71_vm5 = vcmp.lt.s32.totalorder %v50_v17, 3 }
  0x2b   :  { %v65_v46 = vor.u32 %v64_v39, %v63_v31  ;;  %v68_v47 = vor.u32 %v67_v41, %v66_v33  ;;  %v159_v48 = vshll.u32 %v366_v24, %v156_v21  ;;  %v162_v56 = vshll.u32 %v367_v26, %v156_v21 }
  0x2c   :  { %v73_v49 = vsel %vm69_vm2, %v53_v35, %v56_v42  ;;  %v74_v50 = vsel %vm72_vm4, %v62_v44, 2102212464  ;;  %v77_v51 = vsel %vm69_vm2, %v56_v42, %v59_v43  ;;  %v81_v52 = vsel %vm69_vm2, %v59_v43, %v62_v44 }
  0x2d   :  { %v75_v53 = vsel %vm71_vm5, %v59_v43, %v74_v50  ;;  %v78_v54 = vsel %vm72_vm4, %v65_v46, 920167782  ;;  %v82_v55 = vsel %vm72_vm4, %v68_v47, 1326507024  ;;  %v158_v59 = vshrl.u32 %v366_v24, %v157_v45 }
  0x2e   :  { %v79_v57 = vsel %vm71_vm5, %v62_v44, %v78_v54  ;;  %v83_v58 = vsel %vm71_vm5, %v65_v46, %v82_v55  ;;  %v160_v60 = vshrl.u32 %v367_v26, %v157_v45  ;;  %v76_v61 = vsel %vm70_vm3, %v73_v49, %v75_v53 }
  0x2f   :  { %v80_v62 = vsel %vm70_vm3, %v77_v51, %v79_v57  ;;  %v84_v63 = vsel %vm70_vm3, %v81_v52, %v83_v58  ;;  %v163_v3 = vshrl.u32 %v368_v28, %v157_v45  ;;  %v165_v11 = vshll.u32 %v368_v28, %v156_v21 }
  0x30   :  { %v419_v5 = vmul.u32.u64.low %v406_v20, %v84_v63  ;;  %v420_v6 = vmul.u32.u64.high %v406_v20, %v84_v63, %v419_v5  ;;  %v423_v7 = vmul.u32.u64.low %v406_v20, %v80_v62  ;;  %v424_v8 = vmul.u32.u64.high %v406_v20, %v80_v62, %v423_v7 }
  0x31   :  { %v161_v9 = vor.u32 %v160_v60, %v159_v48  ;;  %v164_v10 = vor.u32 %v163_v3, %v162_v56  ;;  %v166_v12 = vshrl.u32 %v369_v30, %v157_v45  ;;  %v168_v13 = vshll.u32 %v369_v30, %v156_v21 }
  0x32   :  { %v169_v14 = vshrl.u32 %v370_v32, %v157_v45  ;;  %v171_v15 = vshll.u32 %v370_v32, %v156_v21  ;;  %v172_v16 = vshrl.u32 %v371_v40, %v157_v45  ;;  %v92_v17 = vmul.u32 %v406_v20, %v76_v61 }
  0x33   :  { %v167_v18 = vor.u32 %v166_v12, %v165_v11  ;;  %vm174_vm6 = vcmp.lt.s32.totalorder %v410_v34, 1  ;;  %vm175_vm7 = vcmp.lt.s32.totalorder %v410_v34, 2  ;;  %vm94_vm8 = vc.u32 %v420_v6, %v423_v7 }
  0x34   :  { %v95_v19 = vadd.s32 1, %v424_v8  ;;  %v170_v23 = vor.u32 %v169_v14, %v168_v13  ;;  %vm176_vm9 = vcmp.lt.s32.totalorder %v410_v34, 3  ;;  %v173_v24 = vor.u32 %v172_v16, %v171_v15 }
  0x35   :  { %vm177_vm10 = vcmp.lt.s32.totalorder %v410_v34, 4  ;;  %v178_v25 = vsel %vm174_vm6, %v158_v59, %v161_v9  ;;  %v182_v21 = vsel %vm174_vm6, %v161_v9, %v164_v10  ;;  %v186_v28 = vsel %vm174_vm6, %v164_v10, %v167_v18 }
  0x36   :  { %v96_v26 = vsel %vm94_vm8, %v95_v19, %v424_v8  ;;  %v179_v20 = vsel %vm177_vm10, %v167_v18, 2102212464  ;;  %v183_v27 = vsel %vm177_vm10, %v170_v23, 920167782  ;;  %v187_v32 = vsel %vm177_vm10, %v173_v24, 1326507024 }
  0x37   :  { %v97_v29 = vadd.s32 %v96_v26, %v92_v17  ;;  %v180_v30 = vsel %vm176_vm9, %v164_v10, %v179_v20  ;;  %v184_v31 = vsel %vm176_vm9, %v167_v18, %v183_v27  ;;  %v188_v36 = vsel %vm176_vm9, %v170_v23, %v187_v32 }
  0x38   :  { %v181_v33 = vsel %vm175_vm7, %v178_v25, %v180_v30  ;;  %v185_v35 = vsel %vm175_vm7, %v182_v21, %v184_v31  ;;  %v189_v38 = vsel %vm175_vm7, %v186_v28, %v188_v36  ;;  %v93_v57 = vadd.s32 %v423_v7, %v420_v6 }
  0x39   :  { %v98_v37 = vadd.s32 536870912, %v97_v29  ;;  %v441_v39 = vmul.u32.u64.low %v408_v22, %v185_v35  ;;  %v442_v40 = vmul.u32.u64.high %v408_v22, %v185_v35, %v441_v39  ;;  %v197_v44 = vmul.u32 %v408_v22, %v181_v33 }
  0x3a   :  { %v445_v41 = vmul.u32.u64.low %v408_v22, %v189_v38  ;;  %v446_v42 = vmul.u32.u64.high %v408_v22, %v189_v38, %v445_v41  ;;  %vm129_vm6 = vweird.f32 %v394_v0  ;;  %vm234_vm9 = vweird.f32 %v396_v1 }
  0x3b   :  { %v99_v43 = vshrl.u32 %v98_v37, 30  ;;  %v200_v46 = vadd.s32 1, %v442_v40 }
  0x3c   :  { %vm199_vm11 = vc.u32 %v446_v42, %v441_v39  ;;  %v198_v13 = vadd.s32 %v441_v39, %v446_v42 }
  0x3d   :  { %v100_v45 = vshll.u32 %v99_v43, 30  ;;  %v201_v34 = vsel %vm199_vm11, %v200_v46, %v442_v40  ;;  %v123_v20 = vsub.s32 4, %v99_v43 }
  0x3e   :  { %v202_v48 = vadd.s32 %v201_v34, %v197_v44 }
  0x3f   :  { %v101_v47 = vsub.s32 %v97_v29, %v100_v45  ;;  %v124_v31 = vsel %vm39_vm14, %v123_v20, %v99_v43 }
  0x40   :  { %v203_v50 = vadd.s32 536870912, %v202_v48  ;;  %v126_v35 = vsel %vm457_vm15, 0, %v124_v31 }
  0x41   :  { %v103_v49 = vsub.s32 0, %v101_v47  ;;  %v130_v39 = vadd.s32 3, %v126_v35 }
  0x42   :  { %v204_v52 = vshrl.u32 %v203_v50, 30 }
  0x43   :  { %v266_v51 = vmin.u32 %v103_v49, %v101_v47  ;;  %v131_v42 = vand.u32 3, %v130_v39 }
  0x44   :  { %v205_v54 = vshll.u32 %v204_v52, 30  ;;  %v228_v37 = vsub.s32 4, %v204_v52 }
  0x45   :  { %v105_v53 = vclz %v266_v51  ;;  %vm133_vm2 = vcmp.eq.s32.totalorder %v131_v42, 0  ;;  %vm136_vm3 = vcmp.eq.s32.totalorder %v131_v42, 2  ;;  %vm132_vm4 = vcmp.lt.s32.totalorder %v131_v42, 2 }
  0x46   :  { %v206_v56 = vsub.s32 %v202_v48, %v205_v54  ;;  %v229_v40 = vsel %vm144_vm0, %v228_v37, %v204_v52 }
  0x47   :  { %v267_v55 = vadd.s32 4294967294, %v105_v53  ;;  %v231_v43 = vsel %vm467_vm1, 0, %v229_v40 }
  0x48   :  { %v208_v58 = vsub.s32 0, %v206_v56  ;;  %v235_v46 = vand.u32 3, %v231_v43 }
  0x49   :  { %vm268_vm12 = vcmp.lt.s32.totalorder %v267_v55, 0 }
  0x4a   :  { %v108_v22 = vsel %vm268_vm12, 0, %v267_v55  ;;  %v270_v62 = vmin.u32 %v208_v58, %v206_v56  ;;  %vm240_vm5 = vcmp.eq.s32.totalorder %v235_v46, 2  ;;  %vm237_vm7 = vcmp.eq.s32.totalorder %v235_v46, 0 }
  0x4b   :  { %v109_v59 = vsub.s32 32, %v108_v22  ;;  %v110_v60 = vshll.u32 %v101_v47, %v108_v22  ;;  %v113_v61 = vsub.s32 4294967266, %v108_v22  ;;  %vm236_vm8 = vcmp.lt.s32.totalorder %v235_v46, 2 }
  0x4c   :  { %v210_v5 = vclz %v270_v62 }
  0x4d   :  { %v111_v63 = vshrl.u32 %v93_v57, %v109_v59  ;;  %v114_v3 = vadd.s32 127, %v113_v61 }
  0x4e   :  { %v271_v10 = vadd.s32 4294967294, %v210_v5 }
  0x4f   :  { %v112_v8 = vor.u32 %v111_v63, %v110_v60  ;;  %v115_v9 = vshll.u32 %v114_v3, 23 }
  0x50   :  { %vm272_vm13 = vcmp.lt.s32.totalorder %v271_v10, 0 }
  0x51   :  { %v116_v11 = vor.u32 4788187, %v115_v9  ;;  %v119_v12 = vcvt.s32.f32 %v112_v8  ;;  %v213_v6 = vsel %vm272_vm13, 0, %v271_v10 }
  0x52   :  { %v214_v7 = vsub.s32 32, %v213_v6  ;;  %v215_v15 = vshll.u32 %v206_v56, %v213_v6  ;;  %v218_v16 = vsub.s32 4294967266, %v213_v6 }
  0x53   :  { %v117_v14 = vand.u32 2147483647, %v116_v11 }
  0x54   :  { %v216_v18 = vshrl.u32 %v198_v13, %v214_v7  ;;  %v219_v19 = vadd.s32 127, %v218_v16 }
  0x55   :  { %v120_v17 = vmul.f32 %v119_v12, %v117_v14 }
  0x56   :  { %v217_v25 = vor.u32 %v216_v18, %v215_v15  ;;  %v220_v21 = vshll.u32 %v219_v19, 23 }
  0x57   :  { %v121_v24 = vxor.u32 2147483648, %v120_v17 }
  0x58   :  { %v221_v28 = vor.u32 4788187, %v220_v21  ;;  %v224_v29 = vcvt.s32.f32 %v217_v25 }
  0x59   :  { %v122_v26 = vsel %vm39_vm14, %v121_v24, %v120_v17 }
  0x5a   :  { %v125_v27 = vsel %vm457_vm15, %v394_v0, %v122_v26  ;;  %v222_v30 = vand.u32 2147483647, %v221_v28 }
  0x5b   :  { %290 = vcosq.f32 %v125_v27 }
  0x5c   :  { %292 = vsinq.f32 %v125_v27  ;;  %v225_v32 = vmul.f32 %v224_v29, %v222_v30 }
  0x5e   :  { %v226_v33 = vxor.u32 2147483648, %v225_v32 }
  0x60   :  { %v227_v36 = vsel %vm144_vm0, %v226_v33, %v225_v32 }
  0x61   :  { %v230_v38 = vsel %vm467_vm1, %v396_v1, %v227_v36 }
  0x62   :  { %294 = vcosq.f32 %v230_v38 }
  0x63   :  { %296 = vsinq.f32 %v230_v38 }
  0x68   :  { %v291_v41 = vpop.eup %290 }
  0x69   :  { %v293_v4 = vpop.eup %292  ;;  %v137_v45 = vxor.u32 2147483648, %v291_v41 }
  0x6a   :  { %v134_v44 = vxor.u32 2147483648, %v293_v4 }
  0x6b   :  { %v138_v34 = vsel %vm136_vm3, %v137_v45, %v293_v4 }
  0x6c   :  { %v135_v47 = vsel %vm133_vm2, %v291_v41, %v134_v44 }
  0x6d   :  { %v139_v50 = vsel %vm132_vm4, %v135_v47, %v138_v34 }
  0x6e   :  { %v140_v54 = vsel %vm129_vm6, nan, %v139_v50 }
  0x6f   :  { %v295_v48 = vpop.eup %294 }
  0x70   :  { %v297_v49 = vpop.eup %296  ;;  %v241_v51 = vxor.u32 2147483648, %v295_v48 }
  0x71   :  { %v238_v52 = vxor.u32 2147483648, %v297_v49 }
  0x72   :  { %v242_v53 = vsel %vm240_vm5, %v241_v51, %v297_v49 }
  0x73   :  { %v239_v55 = vsel %vm237_vm7, %v295_v48, %v238_v52 }
  0x74   :  { %v243_v56 = vsel %vm236_vm8, %v239_v55, %v242_v53 }
  0x75   :  { %v244_v57 = vsel %vm234_vm9, nan, %v243_v56 }
  0x76   :  { %v245_v22 = vmul.f32 %v244_v57, %v140_v54 }
  0x78   :  { %v246_v58 = vadd.f32 1.0, %v245_v22 }
  0x7a   :  { %v247_v59 = vmul.f32 0.5, %v246_v58 }
  0x7c   :  { %248 = vst [vmem:[#allocation7] sm:$0xff] %v247_v59 }
  0x7d   :  { %349 = shalt.err (!%p346_p0)
}
  0x7e   :  { %258 = dma.vmem_to_hbm [thread:$0]  %s256_s1, 128, %s485_s2, [#allocation4]  }
  0x7f   :  { %362 = dma.done.wait [#allocation4], 128  }
  0x80   :  { %363 = vsyncadd [#allocation4], 4294967168 }
  0x81   :  { %262 = vsyncpa [#allocation3], 1 }
  0x82   :  { %263 = vsyncpa [#allocation6], 1 }
  0x83   :  { %264 = vsyncpa [#allocation4], 1 }

</bundles_post_ra>
